<compile_context>
chip_gen: v7x
topology: tpu7x:2x2x1
jax: 0.10.0
libtpu: 0.0.40
codegen_flags: <defaults>
</compile_context>

<pallas_src>
import jax
import jax.numpy as jnp
from jax.experimental import pallas as pl
from jax.experimental.pallas import tpu as pltpu


def _make_critic_kernel(hidden_block):
    """Builds the per-batch-tile kernel (Linear -> ReLU -> Linear -> ReLU).

    Refs seen by the kernel:
      x_ref : (BM, E)  token-0 activations for this batch tile (input dtype)
      w1_ref: (E, H)   layer-1 weight (compute dtype), resident across tiles
      b1_ref: (1, H)   layer-1 bias (f32), resident
      w2_ref: (1, H)   layer-2 weight as a lane-dense f32 row, resident
      b2_ref: (1, 1)   layer-2 bias (f32, SMEM scalar)
      o_ref : (1, BM)  lane-dense per-tile output row
    """

    def kernel(x_ref, w1_ref, b1_ref, w2_ref, b2_ref, o_ref):
        H = w1_ref.shape[1]
        # Single cast per tile so the MXU runs in the compute dtype (bf16 on v6e/v7x).
        x = x_ref[...].astype(w1_ref.dtype)
        y = None
        # Static loop over hidden chunks.  For H <= hidden_block this is exactly
        # one iteration (full-H fast path).  For very large H it keeps the f32
        # `h` intermediate at (BM, hidden_block) so it never spills through VMEM.
        for h0 in range(0, H, hidden_block):
            ch = min(hidden_block, H - h0)
            # Layer 1: MXU matmul with f32 accumulation, bias + ReLU on the VPU.
            h = jnp.dot(x, w1_ref[:, h0:h0 + ch],
                        preferred_element_type=jnp.float32)
            h = jnp.maximum(h + b1_ref[:, h0:h0 + ch], 0.0)
            # Layer 2 (N=1): VPU multiply + XLU lane reduction instead of an MXU pass.
            part = jnp.sum(h * w2_ref[:, h0:h0 + ch], axis=-1)          # (BM,)
            y = part if y is None else y + part
        y = jnp.maximum(y + b2_ref[0, 0], 0.0)
        # Lane-dense store: (BM,) -> (1, BM).
        o_ref[...] = y[None, :].astype(o_ref.dtype)

    return kernel


def critic_forward(encodings, w1, b1, w2, b2, *,
                   block_b=1024, hidden_block=None,
                   compute_dtype=jnp.bfloat16, slice_in_wrapper=None):
    """JAX wrapper matching Critic.forward semantics.

    encodings: (B, S, E) float32
    w1: (E, H), b1: (H,), w2: (H, 1), b2: (1,)
    returns:   (B,) float32

    compute_dtype=jnp.bfloat16 (default) runs the layer-1 matmul in bf16 with f32
    accumulation (v6e/v7x MXU native); pass jnp.float32 to match the PyTorch
    module's f32 numerics exactly.
    """
    B, S, E = encodings.shape
    H = w1.shape[1]
    if compute_dtype is None:
        compute_dtype = encodings.dtype

    # ---- batch tile size ---------------------------------------------------
    bm = min(block_b, B)
    # v7x has 2 TensorCores: make sure the "parallel" batch axis has >= 2 grid
    # steps whenever B is big enough to split (otherwise half the chip idles).
    if B >= 256 and bm * 2 > B:
        bm = pl.cdiv(B, 2)
    # Round to an MXU-friendly width (256 on v6e/v7x) so the (1, bm) output row
    # is an exact multiple of 128 lanes (unmasked vst); else 8 sublanes.
    if bm >= 256:
        bm = (bm // 256) * 256
    elif bm >= 8:
        bm = (bm // 8) * 8
    bm = max(bm, 1)
    num_tiles = pl.cdiv(B, bm)

    # ---- operand preparation (all casts hoisted out of the kernel) ---------
    x_item = jnp.dtype(encodings.dtype).itemsize
    comp_item = jnp.dtype(compute_dtype).itemsize
    w1c = w1.astype(compute_dtype)                      # MXU weight, resident
    b1_row = b1.reshape(1, H).astype(jnp.float32)       # f32: no per-tile casts
    w2_row = w2.reshape(1, H).astype(jnp.float32)
    b2_s = b2.reshape(1, 1).astype(jnp.float32)

    if hidden_block is None:
        # Chunk the hidden dim only when the f32 `h` intermediate would be large.
        hidden_block = H if H <= 2048 else 512
    hidden_block = max(1, min(hidden_block, H))
    kernel = _make_critic_kernel(hidden_block)

    # ---- token-0 gather strategy --------------------------------------------
    if slice_in_wrapper is None:
        # Below ~512 B/row the strided (stride = S*E) token-0 gather is
        # descriptor-bound; one contiguous XLA slice in the wrapper wins.
        slice_in_wrapper = (E * x_item) < 512

    if slice_in_wrapper:
        x_in = encodings[:, 0, :]                       # contiguous (B, E)

        def x_spec(hints):
            return pl.BlockSpec((bm, E), lambda i: (i, 0),
                                pipeline_mode=pl.Buffered(3) if hints else None)
    else:
        x_in = encodings                                # fused strided token-0 DMA

        def x_spec(hints):
            return pl.BlockSpec((bm, pl.Squeezed(), E), lambda i: (i, 0, 0),
                                pipeline_mode=pl.Buffered(3) if hints else None)

    # Rough VMEM budget: 3x-buffered x tile + single-buffered resident W1 + slack.
    need = (3 * bm * E * x_item + E * H * comp_item
            + 2 * H * 4 + 4 * bm * 4 + (1 << 20))
    vmem_limit = int(min(64 * 1024 * 1024, max(32 * 1024 * 1024, 2 * need)))

    cost = pl.CostEstimate(
        flops=2 * B * E * H + 4 * B * H,
        transcendentals=0,
        bytes_accessed=B * E * x_item + E * H * comp_item + 2 * H * 4 + B * 4,
    )

    def build(hints):
        resident = pl.Buffered(1) if hints else None    # single-buffer resident weights
        return pl.pallas_call(
            kernel,
            out_shape=jax.ShapeDtypeStruct((num_tiles, bm), jnp.float32),
            grid=(num_tiles,),
            in_specs=[
                x_spec(hints),
                pl.BlockSpec((E, H), lambda i: (0, 0), pipeline_mode=resident),
                pl.BlockSpec((1, H), lambda i: (0, 0), pipeline_mode=resident),
                pl.BlockSpec((1, H), lambda i: (0, 0), pipeline_mode=resident),
                pl.BlockSpec(memory_space=pltpu.MemorySpace.SMEM),   # b2 scalar
            ],
            out_specs=pl.BlockSpec((1, bm), lambda i: (i, 0)),       # lane-dense row
            compiler_params=pltpu.CompilerParams(
                dimension_semantics=("parallel",),
                vmem_limit_bytes=vmem_limit,
            ),
            cost_estimate=cost,
        )

    args = (x_in, w1c, b1_row, w2_row, b2_s)
    try:
        out = build(True)(*args)
    except Exception:
        # Portability guard: if this jax build rejects the Buffered(1)/Buffered(3)
        # pipeline hints, fall back to default (double) buffering — same semantics.
        out = build(False)(*args)

    # Note: when B % bm != 0 the last tile reads rows past B; those padded lanes
    # may compute garbage values, but they are dropped by the [:B] slice below.
    return out.reshape(-1)[:B]


def init_critic_params(key, embedding_size, hidden_size):
    """Deterministic init mimicking nn.Linear defaults (U(-1/sqrt(fan_in), +1/sqrt(fan_in)))."""
    k1, k2, k3, k4 = jax.random.split(key, 4)
    lim1 = 1.0 / (embedding_size ** 0.5)
    lim2 = 1.0 / (hidden_size ** 0.5)
    w1 = jax.random.uniform(k1, (embedding_size, hidden_size), jnp.float32, -lim1, lim1)
    b1 = jax.random.uniform(k2, (hidden_size,), jnp.float32, -lim1, lim1)
    w2 = jax.random.uniform(k3, (hidden_size, 1), jnp.float32, -lim2, lim2)
    b2 = jax.random.uniform(k4, (1,), jnp.float32, -lim2, lim2)
    return w1, b1, w2, b2


if __name__ == "__main__":
    # Small shapes consistent with the module: batch=2, seq=8, embedding=32, hidden=32.
    B, S, E, H = 2, 8, 32, 32

    key = jax.random.PRNGKey(0)
    k_x, k_p = jax.random.split(key)
    encodings = jax.random.normal(k_x, (B, S, E), dtype=jnp.float32)
    w1, b1, w2, b2 = init_critic_params(k_p, E, H)

    # Reference in plain JAX (same math as the PyTorch module, f32).
    x0 = encodings[:, 0, :]
    ref = jnp.maximum(jnp.maximum(x0 @ w1 + b1, 0.0) @ w2 + b2, 0.0)[:, 0]

    # 1) f32 compute path (matches PyTorch numerics), wrapper-side token-0 slice.
    out_f32 = jax.block_until_ready(
        critic_forward(encodings, w1, b1, w2, b2, compute_dtype=jnp.float32))
    assert out_f32.shape == (B,)
    assert jnp.allclose(out_f32, ref, atol=1e-5, rtol=1e-5), (out_f32, ref)

    # 2) default bf16 compute path (f32 accumulation) — looser tolerance.
    out_bf16 = jax.block_until_ready(critic_forward(encodings, w1, b1, w2, b2))
    assert jnp.allclose(out_bf16, ref, atol=3e-2, rtol=3e-2), (out_bf16, ref)

    # 3) fused strided token-0 DMA path (the large-E BlockSpec path, forced here).
    out_fused = jax.block_until_ready(
        critic_forward(encodings, w1, b1, w2, b2,
                       compute_dtype=jnp.float32, slice_in_wrapper=False))
    assert jnp.allclose(out_fused, ref, atol=1e-5, rtol=1e-5), (out_fused, ref)

    # 4) hidden-dim chunked path (the large-H path, exercised with a tiny chunk).
    out_chunk = jax.block_until_ready(
        critic_forward(encodings, w1, b1, w2, b2,
                       compute_dtype=jnp.float32, hidden_block=16))
    assert jnp.allclose(out_chunk, ref, atol=1e-5, rtol=1e-5), (out_chunk, ref)

    print("KERNEL_OK")
</pallas_src>

<mosaic_0001>
module attributes {stable_mosaic.version = 11 : i64} {
  func.func @kernel(%arg0: i32, %arg1: memref<2x32xf32, #tpu.memory_space<vmem>>, %arg2: memref<32x32xf32, #tpu.memory_space<vmem>>, %arg3: memref<1x32xf32, #tpu.memory_space<vmem>>, %arg4: memref<1x32xf32, #tpu.memory_space<vmem>>, %arg5: memref<1x1xf32, #tpu.memory_space<smem>>, %arg6: memref<1x2xf32, #tpu.memory_space<vmem>>) attributes {dimension_semantics = [#tpu.dimension_semantics<parallel>], iteration_bounds = array<i64: 1>, scalar_prefetch = 0 : i64, scratch_operands = 0 : i64, tpu.core_type = #tpu.core_type<tc>, window_params = [{transform_indices = @transform_0, window_bounds = array<i64: 2, 32>}, {pipeline_mode = #tpu.pipeline_mode<synchronous>, transform_indices = @transform_1, window_bounds = array<i64: 32, 32>}, {pipeline_mode = #tpu.pipeline_mode<synchronous>, transform_indices = @transform_2, window_bounds = array<i64: 1, 32>}, {pipeline_mode = #tpu.pipeline_mode<synchronous>, transform_indices = @transform_3, window_bounds = array<i64: 1, 32>}, {transform_indices = @transform_4, window_bounds = array<i64: 1, 1>}, {transform_indices = @transform_5, window_bounds = array<i64: 1, 2>}]} {
    %c0 = arith.constant 0 : index
    %c0_0 = arith.constant 0 : index
    %0 = vector.load %arg1[%c0, %c0_0] : memref<2x32xf32, #tpu.memory_space<vmem>>, vector<2x32xf32>
    %c0_1 = arith.constant 0 : index
    %c0_2 = arith.constant 0 : index
    %1 = vector.load %arg2[%c0_1, %c0_2] : memref<32x32xf32, #tpu.memory_space<vmem>>, vector<32x32xf32>
    %cst = arith.constant dense<0.000000e+00> : vector<2x32xf32>
    %2 = tpu.matmul %0, %1, %cst {dimension_numbers = #tpu.dot_dimension_numbers<[1], [0], [0], [1], [0, 0, 1, 1], [], []>} : vector<2x32xf32>, vector<32x32xf32>, vector<2x32xf32> -> vector<2x32xf32>
    %c0_3 = arith.constant 0 : index
    %c0_4 = arith.constant 0 : index
    %3 = vector.load %arg3[%c0_3, %c0_4] : memref<1x32xf32, #tpu.memory_space<vmem>>, vector<1x32xf32>
    %4 = vector.broadcast %3 : vector<1x32xf32> to vector<2x32xf32>
    %5 = arith.addf %2, %4 : vector<2x32xf32>
    %cst_5 = arith.constant 0.000000e+00 : f32
    %6 = vector.broadcast %cst_5 : f32 to vector<2x32xf32>
    %7 = arith.maximumf %5, %6 : vector<2x32xf32>
    %c0_6 = arith.constant 0 : index
    %c0_7 = arith.constant 0 : index
    %8 = vector.load %arg4[%c0_6, %c0_7] : memref<1x32xf32, #tpu.memory_space<vmem>>, vector<1x32xf32>
    %9 = vector.broadcast %8 : vector<1x32xf32> to vector<2x32xf32>
    %10 = arith.mulf %7, %9 : vector<2x32xf32>
    %cst_8 = arith.constant dense<0.000000e+00> : vector<2xf32>
    %11 = vector.multi_reduction <add>, %10, %cst_8 [1] : vector<2x32xf32> to vector<2xf32>
    %c0_9 = arith.constant 0 : index
    %c0_10 = arith.constant 0 : index
    %12 = memref.load %arg5[%c0_9, %c0_10] : memref<1x1xf32, #tpu.memory_space<smem>>
    %13 = vector.broadcast %12 : f32 to vector<2xf32>
    %14 = arith.addf %11, %13 : vector<2xf32>
    %cst_11 = arith.constant 0.000000e+00 : f32
    %15 = vector.broadcast %cst_11 : f32 to vector<2xf32>
    %16 = arith.maximumf %14, %15 : vector<2xf32>
    %17 = vector.shape_cast %16 : vector<2xf32> to vector<1x2xf32>
    %c0_12 = arith.constant 0 : index
    %c0_13 = arith.constant 0 : index
    %18 = vector.load %arg6[%c0_12, %c0_13] : memref<1x2xf32, #tpu.memory_space<vmem>>, vector<1x2xf32>
    tpu.vector_store %arg6[%c0_12, %c0_13], %17 {strides = array<i32>} : memref<1x2xf32, #tpu.memory_space<vmem>>, vector<1x2xf32>,
    return
  }
  func.func @transform_0(%arg0: i32) -> (i32, i32) {
    %c0_i32 = arith.constant 0 : i32
    %c0_i32_0 = arith.constant 0 : i32
    return %arg0, %c0_i32 : i32, i32
  }
  func.func @transform_1(%arg0: i32) -> (i32, i32) {
    %c0_i32 = arith.constant 0 : i32
    %c0_i32_0 = arith.constant 0 : i32
    %c0_i32_1 = arith.constant 0 : i32
    return %c0_i32, %c0_i32_0 : i32, i32
  }
  func.func @transform_2(%arg0: i32) -> (i32, i32) {
    %c0_i32 = arith.constant 0 : i32
    %c0_i32_0 = arith.constant 0 : i32
    %c0_i32_1 = arith.constant 0 : i32
    return %c0_i32, %c0_i32_0 : i32, i32
  }
  func.func @transform_3(%arg0: i32) -> (i32, i32) {
    %c0_i32 = arith.constant 0 : i32
    %c0_i32_0 = arith.constant 0 : i32
    %c0_i32_1 = arith.constant 0 : i32
    return %c0_i32, %c0_i32_0 : i32, i32
  }
  func.func @transform_4(%arg0: i32) -> (i32, i32) {
    %c0_i32 = arith.constant 0 : i32
    %c0_i32_0 = arith.constant 0 : i32
    %c0_i32_1 = arith.constant 0 : i32
    return %c0_i32, %c0_i32_0 : i32, i32
  }
  func.func @transform_5(%arg0: i32) -> (i32, i32) {
    %c0_i32 = arith.constant 0 : i32
    %c0_i32_0 = arith.constant 0 : i32
    return %arg0, %c0_i32 : i32, i32
  }
}

</mosaic_0001>

<bundles_post_ra>
// kernel: tpu_custom_call.1
= control target key start
LH: loop header
LB: loop body
LE: loop exit
PB: predicated region body
PF: predicated region fallthrough
CT: control target
= control target key end

     0   :  { %11 = vsyncpa [#allocation4], 0  ;;  %s317_s0 = inlined_call_operand.vmem [shape: f32[2,32], index: 0, kind: input, shape index: {}]   ;;  %s318_s1 = inlined_call_operand.hbm [shape: f32[32,32], index: 1, kind: input, shape index: {}]   ;;  %s319_s2 = inlined_call_operand.vmem [shape: f32[1,32], index: 2, kind: input, shape index: {}]   ;;  %s320_s3 = inlined_call_operand.vmem [shape: f32[1,32], index: 3, kind: input, shape index: {}]   ;;  %s321_s4 = inlined_call_operand.<no memory space> [shape: f32[1,1], index: 4, kind: input, shape index: {}]   ;;  %s322_s5 = inlined_call_operand.hbm [shape: f32[1,2], index: 5, kind: output, shape index: {}]  }
   0x1   :  { %12 = vsyncpa [#allocation5], 0  ;;  %s244_s18 = smov [#allocation3]   ;;  %s196_s22 = scalar_lea.hbm %s318_s1, 512 }
   0x2   :  { %s20_s19 = sshll.u32 %s244_s18, 4  ;;  %p197_p0 = scmp.ne.s32.totalorder %s318_s1, %s196_s22  ;;  %s21_s19 = int_to_ptr.vmem [resolvable:$true] %s20_s19 }
   0x3   :  { %p200_p1 = scmp.lt.u32.totalorder %s196_s22, %s318_s1 }
   0x5   :  { %p202_p2 = pnand %p200_p1, %p197_p0 }
   0x7   :  { %205 = shalt.err (!%p202_p2)
}
   0x8   :  { %s206_s27 = scalar_lea.vmem %s21_s19, 512  ;;  %p211_p4 = scmp.lt.s32.totalorder %s21_s19, %s21_s19 }
   0x9   :  { %p207_p3 = scmp.ne.s32.totalorder %s21_s19, %s206_s27  ;;  %p212_p5 = scmp.lt.s32.totalorder %s206_s27, %s206_s27 }
   0xb   :  { %p213_p6 = por %p212_p5, %p211_p4 }
   0xd   :  { %p214_p7 = pnand %p213_p6, %p207_p3 }
   0xf   :  { %217 = shalt.err (!%p214_p7)
}
  0x10   :  { %s245_s28 = smov 128   ;;  %s246_s29 = smov 8  }
  0x11   :  { %26 = dma.hbm_to_vmem [thread:$0]  %s318_s1, 512, %s21_s19, [#allocation4], %s245_s28, %s245_s28, %s246_s29  }
  0x12   :  { %240 = dma.done.wait [#allocation4], 512  }
  0x13   :  { %241 = vsyncadd [#allocation4], 4294966784  ;;  %v247_v0 = vmov 0.0|0.0   ;;  %vm248_vm0 = vmmov 0   ;;  %v249_v1 = vmov 0.0   ;;  %v37_v2 = vld [vmem:[#allocation3] sm:$0xff]  ;;  %v140_v17 = vlaneseq }
  0x14   :  { %183 = vmatprep.subr.bf16.mxu0 %v247_v0  ;;  %180 = vmatprep.mubr.msk.f32.mxu0 %vm248_vm0, %v249_v1  ;;  %v38_v3 = vld [vmem:[#allocation3 + $0x8] sm:$0xff]  ;;  %v39_v4 = vld [vmem:[#allocation3 + $0x10] sm:$0xff]  ;;  %v40_v6 = vld [vmem:[#allocation3 + $0x18] sm:$0xff]  ;;  %vm48_vm1 = vcmask 261120   ;;  %vm131_vm2 = vcmask 254976   ;;  %v136_v20 = vstv %s321_s4  ;;  %vm147_vm3 = vcmask 8192  }
  0x15   :  { %v184_v5 = vpack.c.bf16 %v38_v3, %v37_v2  ;;  %v187_v7 = vpack.c.bf16 %v40_v6, %v39_v4  ;;  %v36_v8 = vld [vmem:[%s317_s0] sm:$0x3]  ;;  %v141_v18 = vand.u32 127, %v140_v17  ;;  %v143_v19 = vshrl.u32 %v140_v17, 7 }
  0x16   :  { %v164_v9 = vld [vmem:[%s319_s2] ss:$0 sm:$0xff]  ;;  %s250_s2 = smov [#allocation6]  }
  0x17   :  { %185 = vmatpush3.bf16.msra.mxu0 %v184_v5  ;;  %v166_v13 = vld [vmem:[%s320_s3] ss:$0 sm:$0xff]  ;;  %v144_v23 = vsub.s32 %v141_v18, %v143_v19  ;;  %s155_s13 = sshll.u32 %s250_s2, 4  ;;  %s156_s13 = int_to_ptr.vmem [resolvable:$true] %s155_s13 }
  0x18   :  { %186 = vmatprep.subr.bf16.mxu0 %v247_v0  ;;  %s218_s3 = scalar_lea.vmem %s156_s13, 16  ;;  %s222_s14 = scalar_lea.vmem %s156_s13, 32 }
  0x19   :  { %p219_p8 = scmp.ne.s32.totalorder %s156_s13, %s218_s3  ;;  %p223_p9 = scmp.lt.s32.totalorder %s156_s13, %s156_s13 }
  0x1a   :  { %p224_p10 = scmp.lt.s32.totalorder %s222_s14, %s218_s3 }
  0x1b   :  { %188 = vmatpush3.bf16.msra.mxu0 %v187_v7 }
  0x1c   :  { %p225_p11 = por %p224_p10, %p223_p9 }
  0x1e   :  { %181 = vmatmul.mubr.msk.f32.vlgmr.msra.gmra.mrb[0].mxu0 %vm48_vm1, %v36_v8  ;;  %p226_p12 = pnand %p225_p11, %p219_p8 }
  0xf1   :  { %v118_v10 = vpop.f32.mrb[0].mxu0 }
  0xf2   :  { %v119_v11 = vadd.f32 %v164_v9, %v118_v10  ;;  %v182_v12 = vpop.f32.mrb[1].mxu0 }
  0xf4   :  { %v122_v14 = vmax.f32 %v119_v11, 0.0 }
  0xf6   :  { %v130_v15 = vmul.f32 %v166_v13, %v122_v14 }
  0xf8   :  { %v132_v16 = vsel %vm131_vm2, %v130_v15, 0.0 }
  0xf9   :  { %133 = vadd.xlane.f32.xlu0 %v132_v16 }
 0x186   :  { %v134_v21 = vpop.xlane.xlu0 %133 }
 0x187   :  { %v137_v22 = vadd.f32 %v136_v20, %v134_v21 }
 0x189   :  { %v138_v24 = vmax.f32 %v137_v22, 0.0 }
 0x18b   :  { %v145_v25 = vrot.slane %v138_v24, %v144_v23 }
 0x18d   :  { %148 = vst.msk [vmem:[#allocation6] sm:$0x1] %vm147_vm3, %v145_v25 }
 0x18e   :  { %229 = shalt.err (!%p226_p12)
}
 0x18f   :  { %s230_s16 = scalar_lea.hbm %s322_s5, 16 }
 0x190   :  { %p231_p13 = scmp.ne.s32.totalorder %s322_s5, %s230_s16  ;;  %p234_p0 = scmp.lt.u32.totalorder %s230_s16, %s322_s5 }
 0x192   :  { %p236_p1 = pnand %p234_p0, %p231_p13 }
 0x194   :  { %239 = shalt.err (!%p236_p1)
}
 0x195   :  { %158 = dma.vmem_to_hbm [thread:$0]  %s156_s13, 16, %s322_s5, [#allocation5]  }
 0x196   :  { %242 = dma.done.wait [#allocation5], 16  }
 0x197   :  { %243 = vsyncadd [#allocation5], 4294967280 }
 0x198   :  { %162 = vsyncpa [#allocation4], 1 }
 0x199   :  { %163 = vsyncpa [#allocation5], 1 }

</bundles_post_ra>
